<compile_context>
chip_gen: v5e
topology: v5e:2x2
jax: 0.10.0
libtpu: 0.0.40
codegen_flags: <defaults>
</compile_context>

<pallas_src>
import jax
import jax.numpy as jnp
from jax.experimental import pallas as pl
from jax.experimental.pallas import tpu as pltpu

FEAT = 64               # hidden width of every Linear layer
PACK = 2 * FEAT         # two samples packed per 128-lane row
MAX_TILE_ROWS = 2048    # packed rows per grid step (== 4096 original rows)


def _mlp_kernel(x_ref, w_ref, b_ref, o_ref):
    """Fused 4-layer MLP on lane-packed activations.

    x_ref: (tile_r, 128) f32    -- two samples per row (cast to bf16 here)
    w_ref: (4, 128, 128) bf16   -- block-diag([Wt_k, Wt_k])
    b_ref: (4, 1, 128) f32      -- [b_k | b_k]
    o_ref: (tile_r, 128) f32
    """
    h = x_ref[...].astype(jnp.bfloat16)
    for k in range(4):                               # static unroll (4 layers)
        acc = jnp.dot(h, w_ref[k], preferred_element_type=jnp.float32)
        acc = jnp.maximum(acc + b_ref[k], 0.0)       # bias + ReLU in f32
        h = acc.astype(jnp.bfloat16) if k < 3 else acc
    o_ref[...] = h                                   # f32 lane-dense store


def deep_w_encoder_forward(x, params, *, max_tile_rows=MAX_TILE_ROWS):
    """x: (B, 64) float32.  params: list of 4 (W, b) pairs with W: (64, 64)
    in PyTorch layout (out, in) and b: (64,).  Returns (B, 64) float32."""
    B, F = x.shape
    assert F == FEAT

    # --- choose padded batch / tile sizes (packed rows = 2 samples each) ---
    B_pad = ((B + 15) // 16) * 16          # packed rows multiple of 8
    R = B_pad // 2
    if R <= max_tile_rows:
        tile_r = R                         # small batch: single block
    else:
        tile_r = max_tile_rows
        R = ((R + tile_r - 1) // tile_r) * tile_r
        B_pad = 2 * R
    n_tiles = R // tile_r

    x = jnp.asarray(x, jnp.float32)
    if B_pad != B:
        x = jnp.pad(x, ((0, B_pad - B), (0, 0)))
    x_packed = x.reshape(R, PACK)                                # f32, lane-dense

    # --- pack weights: block-diag([Wt, Wt]) so packed rows stay independent ---
    zero = jnp.zeros((FEAT, FEAT), jnp.float32)
    w_blocks, b_blocks = [], []
    for (w, b) in params:
        wt = jnp.asarray(w, jnp.float32).T                       # (in, out)
        top = jnp.concatenate([wt, zero], axis=1)
        bot = jnp.concatenate([zero, wt], axis=1)
        w_blocks.append(jnp.concatenate([top, bot], axis=0))     # (128, 128)
        bb = jnp.asarray(b, jnp.float32)
        b_blocks.append(jnp.concatenate([bb, bb])[None, :])      # (1, 128)
    w_packed = jnp.stack(w_blocks).astype(jnp.bfloat16)          # (4, 128, 128)
    b_packed = jnp.stack(b_blocks)                               # (4, 1, 128) f32

    x_spec = pl.BlockSpec((tile_r, PACK), lambda i: (i, 0))
    w_spec = pl.BlockSpec((4, PACK, PACK), lambda i: (0, 0, 0))  # VMEM-resident
    b_spec = pl.BlockSpec((4, 1, PACK), lambda i: (0, 0, 0))     # VMEM-resident
    out_spec = pl.BlockSpec((tile_r, PACK), lambda i: (i, 0))

    out_packed = pl.pallas_call(
        _mlp_kernel,
        out_shape=jax.ShapeDtypeStruct((R, PACK), jnp.float32),
        grid_spec=pltpu.PrefetchScalarGridSpec(
            num_scalar_prefetch=0,
            grid=(n_tiles,),
            in_specs=[x_spec, w_spec, b_spec],
            out_specs=out_spec,
        ),
        compiler_params=pltpu.CompilerParams(
            dimension_semantics=("parallel",)),
    )(x_packed, w_packed, b_packed)

    return out_packed.reshape(B_pad, FEAT)[:B]


def _init_params(key):
    """PyTorch nn.Linear default init: U[-1/sqrt(in), 1/sqrt(in)]."""
    params = []
    bound = 1.0 / jnp.sqrt(jnp.float32(FEAT))
    for _ in range(4):
        kw, kb, key = jax.random.split(key, 3)
        w = jax.random.uniform(kw, (FEAT, FEAT), jnp.float32, -bound, bound)  # (out, in)
        b = jax.random.uniform(kb, (FEAT,), jnp.float32, -bound, bound)
        params.append((w, b))
    return params


def _reference(x, params):
    h = x
    for (w, b) in params:
        h = jnp.maximum(h @ w.T + b, 0.0)
    return h


if __name__ == "__main__":
    key = jax.random.PRNGKey(0)
    kx, kp = jax.random.split(key)

    B = 16  # small batch; features fixed at 64 by the Linear(64, 64) stack
    x = jax.random.normal(kx, (B, FEAT), jnp.float32)
    params = _init_params(kp)

    out = deep_w_encoder_forward(x, params)
    out = jax.block_until_ready(out)

    ref = _reference(x, params)
    assert out.shape == (B, FEAT)
    # bf16 matmul operands (f32 accumulation) -> slightly relaxed tolerance.
    assert jnp.allclose(out, ref, atol=5e-2, rtol=5e-2), "mismatch vs reference"

    print("KERNEL_OK")
</pallas_src>

<mosaic_0001>
module attributes {stable_mosaic.version = 11 : i64} {
  func.func @_mlp_kernel(%arg0: i32, %arg1: memref<8x128xf32, #tpu.memory_space<vmem>>, %arg2: memref<4x128x128xbf16, #tpu.memory_space<vmem>>, %arg3: memref<4x1x128xf32, #tpu.memory_space<vmem>>, %arg4: memref<8x128xf32, #tpu.memory_space<vmem>>) attributes {dimension_semantics = [#tpu.dimension_semantics<parallel>], iteration_bounds = array<i64: 1>, scalar_prefetch = 0 : i64, scratch_operands = 0 : i64, tpu.core_type = #tpu.core_type<tc>, window_params = [{transform_indices = @transform_0, window_bounds = array<i64: 8, 128>}, {pipeline_mode = #tpu.pipeline_mode<synchronous>, transform_indices = @transform_1, window_bounds = array<i64: 4, 128, 128>}, {pipeline_mode = #tpu.pipeline_mode<synchronous>, transform_indices = @transform_2, window_bounds = array<i64: 4, 1, 128>}, {transform_indices = @transform_3, window_bounds = array<i64: 8, 128>}]} {
    %c0 = arith.constant 0 : index
    %c0_0 = arith.constant 0 : index
    %0 = vector.load %arg1[%c0, %c0_0] : memref<8x128xf32, #tpu.memory_space<vmem>>, vector<8x128xf32>
    %1 = arith.truncf %0 : vector<8x128xf32> to vector<8x128xbf16>
    %c0_1 = arith.constant 0 : index
    %c0_2 = arith.constant 0 : index
    %c0_3 = arith.constant 0 : index
    %2 = vector.load %arg2[%c0_1, %c0_2, %c0_3] : memref<4x128x128xbf16, #tpu.memory_space<vmem>>, vector<1x128x128xbf16>
    %3 = vector.shape_cast %2 : vector<1x128x128xbf16> to vector<128x128xbf16>
    %cst = arith.constant dense<0.000000e+00> : vector<8x128xf32>
    %4 = tpu.matmul %1, %3, %cst {dimension_numbers = #tpu.dot_dimension_numbers<[1], [0], [0], [1], [0, 0, 1, 1], [], []>} : vector<8x128xbf16>, vector<128x128xbf16>, vector<8x128xf32> -> vector<8x128xf32>
    %c0_4 = arith.constant 0 : index
    %c0_5 = arith.constant 0 : index
    %c0_6 = arith.constant 0 : index
    %5 = vector.load %arg3[%c0_4, %c0_5, %c0_6] : memref<4x1x128xf32, #tpu.memory_space<vmem>>, vector<1x1x128xf32>
    %6 = vector.shape_cast %5 : vector<1x1x128xf32> to vector<1x128xf32>
    %7 = vector.broadcast %6 : vector<1x128xf32> to vector<8x128xf32>
    %8 = arith.addf %4, %7 : vector<8x128xf32>
    %cst_7 = arith.constant 0.000000e+00 : f32
    %9 = vector.broadcast %cst_7 : f32 to vector<8x128xf32>
    %10 = arith.maximumf %8, %9 : vector<8x128xf32>
    %11 = arith.truncf %10 : vector<8x128xf32> to vector<8x128xbf16>
    %c1 = arith.constant 1 : index
    %c0_8 = arith.constant 0 : index
    %c0_9 = arith.constant 0 : index
    %12 = vector.load %arg2[%c1, %c0_8, %c0_9] : memref<4x128x128xbf16, #tpu.memory_space<vmem>>, vector<1x128x128xbf16>
    %13 = vector.shape_cast %12 : vector<1x128x128xbf16> to vector<128x128xbf16>
    %cst_10 = arith.constant dense<0.000000e+00> : vector<8x128xf32>
    %14 = tpu.matmul %11, %13, %cst_10 {dimension_numbers = #tpu.dot_dimension_numbers<[1], [0], [0], [1], [0, 0, 1, 1], [], []>} : vector<8x128xbf16>, vector<128x128xbf16>, vector<8x128xf32> -> vector<8x128xf32>
    %c1_11 = arith.constant 1 : index
    %c0_12 = arith.constant 0 : index
    %c0_13 = arith.constant 0 : index
    %15 = vector.load %arg3[%c1_11, %c0_12, %c0_13] : memref<4x1x128xf32, #tpu.memory_space<vmem>>, vector<1x1x128xf32>
    %16 = vector.shape_cast %15 : vector<1x1x128xf32> to vector<1x128xf32>
    %17 = vector.broadcast %16 : vector<1x128xf32> to vector<8x128xf32>
    %18 = arith.addf %14, %17 : vector<8x128xf32>
    %cst_14 = arith.constant 0.000000e+00 : f32
    %19 = vector.broadcast %cst_14 : f32 to vector<8x128xf32>
    %20 = arith.maximumf %18, %19 : vector<8x128xf32>
    %21 = arith.truncf %20 : vector<8x128xf32> to vector<8x128xbf16>
    %c2 = arith.constant 2 : index
    %c0_15 = arith.constant 0 : index
    %c0_16 = arith.constant 0 : index
    %22 = vector.load %arg2[%c2, %c0_15, %c0_16] : memref<4x128x128xbf16, #tpu.memory_space<vmem>>, vector<1x128x128xbf16>
    %23 = vector.shape_cast %22 : vector<1x128x128xbf16> to vector<128x128xbf16>
    %cst_17 = arith.constant dense<0.000000e+00> : vector<8x128xf32>
    %24 = tpu.matmul %21, %23, %cst_17 {dimension_numbers = #tpu.dot_dimension_numbers<[1], [0], [0], [1], [0, 0, 1, 1], [], []>} : vector<8x128xbf16>, vector<128x128xbf16>, vector<8x128xf32> -> vector<8x128xf32>
    %c2_18 = arith.constant 2 : index
    %c0_19 = arith.constant 0 : index
    %c0_20 = arith.constant 0 : index
    %25 = vector.load %arg3[%c2_18, %c0_19, %c0_20] : memref<4x1x128xf32, #tpu.memory_space<vmem>>, vector<1x1x128xf32>
    %26 = vector.shape_cast %25 : vector<1x1x128xf32> to vector<1x128xf32>
    %27 = vector.broadcast %26 : vector<1x128xf32> to vector<8x128xf32>
    %28 = arith.addf %24, %27 : vector<8x128xf32>
    %cst_21 = arith.constant 0.000000e+00 : f32
    %29 = vector.broadcast %cst_21 : f32 to vector<8x128xf32>
    %30 = arith.maximumf %28, %29 : vector<8x128xf32>
    %31 = arith.truncf %30 : vector<8x128xf32> to vector<8x128xbf16>
    %c3 = arith.constant 3 : index
    %c0_22 = arith.constant 0 : index
    %c0_23 = arith.constant 0 : index
    %32 = vector.load %arg2[%c3, %c0_22, %c0_23] : memref<4x128x128xbf16, #tpu.memory_space<vmem>>, vector<1x128x128xbf16>
    %33 = vector.shape_cast %32 : vector<1x128x128xbf16> to vector<128x128xbf16>
    %cst_24 = arith.constant dense<0.000000e+00> : vector<8x128xf32>
    %34 = tpu.matmul %31, %33, %cst_24 {dimension_numbers = #tpu.dot_dimension_numbers<[1], [0], [0], [1], [0, 0, 1, 1], [], []>} : vector<8x128xbf16>, vector<128x128xbf16>, vector<8x128xf32> -> vector<8x128xf32>
    %c3_25 = arith.constant 3 : index
    %c0_26 = arith.constant 0 : index
    %c0_27 = arith.constant 0 : index
    %35 = vector.load %arg3[%c3_25, %c0_26, %c0_27] : memref<4x1x128xf32, #tpu.memory_space<vmem>>, vector<1x1x128xf32>
    %36 = vector.shape_cast %35 : vector<1x1x128xf32> to vector<1x128xf32>
    %37 = vector.broadcast %36 : vector<1x128xf32> to vector<8x128xf32>
    %38 = arith.addf %34, %37 : vector<8x128xf32>
    %cst_28 = arith.constant 0.000000e+00 : f32
    %39 = vector.broadcast %cst_28 : f32 to vector<8x128xf32>
    %40 = arith.maximumf %38, %39 : vector<8x128xf32>
    %c0_29 = arith.constant 0 : index
    %c0_30 = arith.constant 0 : index
    %41 = vector.load %arg4[%c0_29, %c0_30] : memref<8x128xf32, #tpu.memory_space<vmem>>, vector<8x128xf32>
    tpu.vector_store %arg4[%c0_29, %c0_30], %40 {strides = array<i32>} : memref<8x128xf32, #tpu.memory_space<vmem>>, vector<8x128xf32>,
    return
  }
  func.func @transform_0(%arg0: i32) -> (i32, i32) {
    %c0_i32 = arith.constant 0 : i32
    %c0_i32_0 = arith.constant 0 : i32
    return %arg0, %c0_i32 : i32, i32
  }
  func.func @transform_1(%arg0: i32) -> (i32, i32, i32) {
    %c0_i32 = arith.constant 0 : i32
    %c0_i32_0 = arith.constant 0 : i32
    %c0_i32_1 = arith.constant 0 : i32
    %c0_i32_2 = arith.constant 0 : i32
    return %c0_i32, %c0_i32_0, %c0_i32_1 : i32, i32, i32
  }
  func.func @transform_2(%arg0: i32) -> (i32, i32, i32) {
    %c0_i32 = arith.constant 0 : i32
    %c0_i32_0 = arith.constant 0 : i32
    %c0_i32_1 = arith.constant 0 : i32
    %c0_i32_2 = arith.constant 0 : i32
    return %c0_i32, %c0_i32_0, %c0_i32_1 : i32, i32, i32
  }
  func.func @transform_3(%arg0: i32) -> (i32, i32) {
    %c0_i32 = arith.constant 0 : i32
    %c0_i32_0 = arith.constant 0 : i32
    return %arg0, %c0_i32 : i32, i32
  }
}

</mosaic_0001>

<bundles_post_ra>
// kernel: tpu_custom_call.1
= control target key start
LH: loop header
LB: loop body
LE: loop exit
PB: predicated region body
PF: predicated region fallthrough
CT: control target
= control target key end

     0   :  { %8 = vsyncpa [#allocation3], 0  ;;  %s732_s0 = inlined_call_operand.hbm [shape: f32[8,128], index: 0, kind: input, shape index: {}]   ;;  %s733_s1 = inlined_call_operand.hbm [shape: bf16[4,128,128], index: 1, kind: input, shape index: {}]   ;;  %s734_s2 = inlined_call_operand.hbm [shape: f32[4,1,128], index: 2, kind: input, shape index: {}]   ;;  %s735_s3 = inlined_call_operand.hbm [shape: f32[8,128], index: 3, kind: output, shape index: {}]  }
   0x1   :  { %9 = vsyncpa [#allocation6], 0  ;;  %s26_s14 = sshll.u32 %s733_s1, 4  ;;  %s27_s14 = int_to_ptr.hbm [resolvable:$true] %s26_s14 }
   0x2   :  { %10 = vsyncpa [#allocation4], 0  ;;  %s692_s15 = smov [#allocation5]   ;;  %s16_s19 = sshll.u32 %s732_s0, 4  ;;  %s17_s19 = int_to_ptr.hbm [resolvable:$true] %s16_s19 }
   0x3   :  { %s28_s16 = sshll.u32 %s692_s15, 4  ;;  %s693_s20 = smov 64   ;;  %s29_s16 = int_to_ptr.vmem [resolvable:$true] %s28_s16 }
   0x4   :  { %s694_s21 = smov 4   ;;  %s695_s22 = smov [#allocation2]  }
   0x5   :  { %34 = dma.hbm_to_vmem [thread:$0]  %s27_s14, 4096, %s29_s16, [#allocation6], %s693_s20, %s693_s20, %s694_s21  }
   0x6   :  { %s18_s23 = sshll.u32 %s695_s22, 4  ;;  %s39_s26 = sshll.u32 %s734_s2, 4  ;;  %s19_s23 = int_to_ptr.vmem [resolvable:$true] %s18_s23  ;;  %s40_s26 = int_to_ptr.hbm [resolvable:$true] %s39_s26 }
   0x7   :  { %21 = dma.hbm_to_vmem [thread:$0]  %s17_s19, 128, %s19_s23, [#allocation3]  }
   0x8   :  { %s696_s1 = smov [#allocation7]   ;;  %s697_s28 = smov 16  }
   0x9   :  { %s41_s27 = sshll.u32 %s696_s1, 4  ;;  %s698_s29 = smov 1   ;;  %s42_s27 = int_to_ptr.vmem [resolvable:$true] %s41_s27 }
   0xa   :  { %47 = dma.hbm_to_vmem [thread:$0]  %s40_s26, 64, %s42_s27, [#allocation6], %s697_s28, %s697_s28, %s698_s29  }
   0xb   :  { %686 = dma.done.wait [#allocation3], 128  }
   0xc   :  { %687 = vsyncadd [#allocation3], 4294967168 }
   0xd   :  { %688 = dma.done.wait [#allocation6], 4160  }
   0xe   :  { %689 = vsyncadd [#allocation6], 4294963136  ;;  %v553_v0 = vld [vmem:[#allocation5 + $0x38] sm:$0xff]  ;;  %v552_v1 = vld [vmem:[#allocation5 + $0x30] sm:$0xff]  ;;  %s699_s0 = smov [#allocation8]   ;;  %s407_s5 = sshll.u32 %s735_s3, 4  ;;  %s408_s5 = int_to_ptr.hbm [resolvable:$true] %s407_s5 }
   0xf   :  { %130 = vmatpush.bf16.msra.mxu0 %v553_v0  ;;  %v561_v2 = vld [vmem:[#allocation5 + $0x78] sm:$0xff]  ;;  %v560_v3 = vld [vmem:[#allocation5 + $0x70] sm:$0xff]  ;;  %v551_v4 = vld [vmem:[#allocation5 + $0x28] sm:$0xff]  ;;  %s405_s2 = sshll.u32 %s699_s0, 4  ;;  %s406_s2 = int_to_ptr.vmem [resolvable:$true] %s405_s2 }
  0x10   :  { %215 = vmatpush.bf16.msra.mxu1 %v561_v2  ;;  %v559_v5 = vld [vmem:[#allocation5 + $0x68] sm:$0xff]  ;;  %v550_v6 = vld [vmem:[#allocation5 + $0x20] sm:$0xff]  ;;  %v549_v8 = vld [vmem:[#allocation5 + $0x18] sm:$0xff] }
  0x11   :  { %v558_v7 = vld [vmem:[#allocation5 + $0x60] sm:$0xff]  ;;  %v557_v9 = vld [vmem:[#allocation5 + $0x58] sm:$0xff]  ;;  %v548_v10 = vld [vmem:[#allocation5 + $0x10] sm:$0xff] }
  0x12   :  { %v556_v11 = vld [vmem:[#allocation5 + $0x50] sm:$0xff]  ;;  %v547_v12 = vld [vmem:[#allocation5 + $0x8] sm:$0xff]  ;;  %v546_v13 = vld [vmem:[#allocation5] sm:$0xff] }
  0x13   :  { %131 = vmatpush.bf16.msra.mxu0 %v552_v1  ;;  %v60_v14 = vld [vmem:[#allocation2] sm:$0xff]  ;;  %v555_v16 = vld [vmem:[#allocation5 + $0x48] sm:$0xff]  ;;  %v554_v17 = vld [vmem:[#allocation5 + $0x40] sm:$0xff] }
  0x14   :  { %216 = vmatpush.bf16.msra.mxu1 %v560_v3  ;;  %v61_v15 = vpack.c.bf16 %v60_v14, %v60_v14  ;;  %v569_v18 = vld [vmem:[#allocation5 + $0xb8] sm:$0xff]  ;;  %v568_v19 = vld [vmem:[#allocation5 + $0xb0] sm:$0xff]  ;;  %v567_v20 = vld [vmem:[#allocation5 + $0xa8] sm:$0xff] }
  0x15   :  { %300 = vmatpush.bf16.msra.mxu2 %v569_v18  ;;  %v566_v21 = vld [vmem:[#allocation5 + $0xa0] sm:$0xff]  ;;  %v565_v22 = vld [vmem:[#allocation5 + $0x98] sm:$0xff]  ;;  %v564_v23 = vld [vmem:[#allocation5 + $0x90] sm:$0xff] }
  0x16   :  { %v586_v24 = vld [vmem:[#allocation7] ss:$0 sm:$0xff]  ;;  %v563_v30 = vld [vmem:[#allocation5 + $0x88] sm:$0xff]  ;;  %v577_v32 = vld [vmem:[#allocation5 + $0xf8] sm:$0xff] }
  0x17   :  { %132 = vmatpush.bf16.msra.mxu0 %v551_v4  ;;  %v562_v31 = vld [vmem:[#allocation5 + $0x80] sm:$0xff]  ;;  %385 = vmatpush.bf16.msra.mxu3 %v577_v32  ;;  %v576_v33 = vld [vmem:[#allocation5 + $0xf0] sm:$0xff]  ;;  %v575_v34 = vld [vmem:[#allocation5 + $0xe8] sm:$0xff] }
  0x18   :  { %217 = vmatpush.bf16.msra.mxu1 %v559_v5  ;;  %v574_v35 = vld [vmem:[#allocation5 + $0xe0] sm:$0xff]  ;;  %v573_v36 = vld [vmem:[#allocation5 + $0xd8] sm:$0xff]  ;;  %v572_v37 = vld [vmem:[#allocation5 + $0xd0] sm:$0xff] }
  0x19   :  { %301 = vmatpush.bf16.msra.mxu2 %v568_v19  ;;  %v587_v38 = vld [vmem:[#allocation7 + $0x1] ss:$0 sm:$0xff]  ;;  %v571_v44 = vld [vmem:[#allocation5 + $0xc8] sm:$0xff]  ;;  %v588_v46 = vld [vmem:[#allocation7 + $0x2] ss:$0 sm:$0xff] }
  0x1a   :  { %v570_v45 = vld [vmem:[#allocation5 + $0xc0] sm:$0xff] }
  0x1b   :  { %133 = vmatpush.bf16.msra.mxu0 %v550_v6  ;;  %386 = vmatpush.bf16.msra.mxu3 %v576_v33  ;;  %v589_v52 = vld [vmem:[#allocation7 + $0x3] ss:$0 sm:$0xff] }
  0x1c   :  { %218 = vmatpush.bf16.msra.mxu1 %v558_v7 }
  0x1d   :  { %302 = vmatpush.bf16.msra.mxu2 %v567_v20 }
  0x1f   :  { %134 = vmatpush.bf16.msra.mxu0 %v549_v8  ;;  %387 = vmatpush.bf16.msra.mxu3 %v575_v34 }
  0x20   :  { %219 = vmatpush.bf16.msra.mxu1 %v557_v9 }
  0x21   :  { %303 = vmatpush.bf16.msra.mxu2 %v566_v21 }
  0x23   :  { %135 = vmatpush.bf16.msra.mxu0 %v548_v10  ;;  %388 = vmatpush.bf16.msra.mxu3 %v574_v35 }
  0x24   :  { %220 = vmatpush.bf16.msra.mxu1 %v556_v11 }
  0x25   :  { %304 = vmatpush.bf16.msra.mxu2 %v565_v22 }
  0x27   :  { %136 = vmatpush.bf16.msra.mxu0 %v547_v12  ;;  %389 = vmatpush.bf16.msra.mxu3 %v573_v36 }
  0x28   :  { %221 = vmatpush.bf16.msra.mxu1 %v555_v16 }
  0x29   :  { %305 = vmatpush.bf16.msra.mxu2 %v564_v23 }
  0x2b   :  { %137 = vmatpush.bf16.msra.mxu0 %v546_v13  ;;  %390 = vmatpush.bf16.msra.mxu3 %v572_v37 }
  0x2c   :  { %222 = vmatpush.bf16.msra.mxu1 %v554_v17 }
  0x2d   :  { %306 = vmatpush.bf16.msra.mxu2 %v563_v30 }
  0x2e   :  { %138 = vmatmul.bf16.vlgmr.msra.gmra.mxu0 %v61_v15 }
  0x2f   :  { %391 = vmatpush.bf16.msra.mxu3 %v571_v44 }
  0x31   :  { %307 = vmatpush.bf16.msra.mxu2 %v562_v31 }
  0x33   :  { %392 = vmatpush.bf16.msra.mxu3 %v570_v45 }
  0xab   :  { %v139_v25 = vpop.f32.mrf.mxu0 }
  0xac   :  { %v140_v26 = vadd.f32 %v586_v24, %v139_v25 }
  0xae   :  { %v143_v27 = vmax.f32 %v140_v26, 0.0 }
  0xb0   :  { %v144_v28 = vpack.c.bf16 %v143_v27, %v143_v27 }
  0xb2   :  { %223 = vmatmul.bf16.vlgmr.msra.gmra.mxu1 %v144_v28 }
  0xb3   :  { %v141_v29 = vpop.f32.mrf.mxu0 }
 0x12f   :  { %v224_v39 = vpop.f32.mrf.mxu1 }
 0x130   :  { %v225_v40 = vadd.f32 %v587_v38, %v224_v39 }
 0x132   :  { %v228_v41 = vmax.f32 %v225_v40, 0.0 }
 0x134   :  { %v229_v42 = vpack.c.bf16 %v228_v41, %v228_v41 }
 0x136   :  { %308 = vmatmul.bf16.vlgmr.msra.gmra.mxu2 %v229_v42 }
 0x137   :  { %v226_v43 = vpop.f32.mrf.mxu1 }
 0x1b9   :  { %v309_v47 = vpop.f32.mrf.mxu2 }
 0x1ba   :  { %v310_v48 = vadd.f32 %v588_v46, %v309_v47 }
 0x1bc   :  { %v313_v49 = vmax.f32 %v310_v48, 0.0 }
 0x1be   :  { %v314_v50 = vpack.c.bf16 %v313_v49, %v313_v49 }
 0x1c0   :  { %393 = vmatmul.bf16.vlgmr.msra.gmra.mxu3 %v314_v50 }
 0x1c1   :  { %v311_v51 = vpop.f32.mrf.mxu2 }
 0x243   :  { %v394_v53 = vpop.f32.mrf.mxu3 }
 0x244   :  { %v395_v54 = vadd.f32 %v589_v52, %v394_v53 }
 0x246   :  { %v398_v55 = vmax.f32 %v395_v54, 0.0 }
 0x248   :  { %399 = vst [vmem:[#allocation8] sm:$0xff] %v398_v55 }
 0x249   :  { %410 = dma.vmem_to_hbm [thread:$0]  %s406_s2, 128, %s408_s5, [#allocation4]  }
 0x24b   :  { %v396_v56 = vpop.f32.mrf.mxu3 }
 0x24c   :  { %690 = dma.done.wait [#allocation4], 128  }
 0x24d   :  { %691 = vsyncadd [#allocation4], 4294967168 }
 0x24e   :  { %415 = vsyncpa [#allocation3], 1 }
 0x24f   :  { %416 = vsyncpa [#allocation6], 1 }
 0x250   :  { %417 = vsyncpa [#allocation4], 1 }

</bundles_post_ra>
